<compile_context>
chip_gen: v5e
topology: v5e:2x2
jax: 0.10.0
libtpu: 0.0.40
codegen_flags: <defaults>
</compile_context>

<pallas_src>
import functools
import math

import jax
import jax.numpy as jnp
from jax.experimental import pallas as pl
from jax.experimental.pallas import tpu as pltpu

# torch.nan_to_num arguments used explicitly by the module.
_POSINF = 1.0e6
_NEGINF = -1.0e6


def _nan_to_num_exact(x, nan=0.0, posinf=_POSINF, neginf=_NEGINF):
    """Exact torch.nan_to_num(x, nan=, posinf=, neginf=). Wrapper-side / reference only."""
    x = jnp.where(jnp.isnan(x), jnp.asarray(nan, x.dtype), x)
    x = jnp.where(x == jnp.inf, jnp.asarray(posinf, x.dtype), x)
    x = jnp.where(x == -jnp.inf, jnp.asarray(neginf, x.dtype), x)
    return x


def _sanitize(x, nan):
    """In-kernel nan_to_num: isnan-select + clip (min+max).  Matches torch for NaN/+-inf;
    additionally clips pathological finite |x| > 1e6 (2 VALU ops cheaper per vreg)."""
    return jnp.clip(jnp.where(jnp.isnan(x), jnp.float32(nan), x), _NEGINF, _POSINF)


def pack_prior(prior_mean, prior_logvar, *, fold=1):
    """Precompute prior constants once: rows [p_mean, 0.5/p_var, 0.5*(log p_var - 1)],
    tiled `fold` times along lanes and padded to a full 8-sublane vreg (unmasked vld)."""
    p_mean = _nan_to_num_exact(prior_mean.reshape(-1).astype(jnp.float32), nan=0.0)
    p_std = jnp.exp(0.5 * prior_logvar.reshape(-1).astype(jnp.float32))
    p_std = _nan_to_num_exact(p_std, nan=1e-10)
    p_var = p_std * p_std
    half_inv_p_var = 0.5 / p_var
    p_const = 0.5 * (jnp.log(p_var) - 1.0)
    if fold > 1:
        p_mean = jnp.tile(p_mean, fold)
        half_inv_p_var = jnp.tile(half_inv_p_var, fold)
        p_const = jnp.tile(p_const, fold)
    packed = jnp.stack([p_mean, half_inv_p_var, p_const], axis=0)      # (3, lanes)
    lanes = packed.shape[1]
    return jnp.concatenate([packed, jnp.zeros((5, lanes), jnp.float32)], axis=0)  # (8, lanes)


def _kl_partial_kernel(q_mean_ref, q_std_ref, prior_ref, out_ref, *,
                       total_rows, tile_rows, lanes):
    i = pl.program_id(0)
    nt = pl.num_programs(0)

    def partial_sum(mask_rows):
        # Cast in-kernel (bf16 inputs halve HBM traffic), then cheap nan_to_num.
        qm = _sanitize(q_mean_ref[...].astype(jnp.float32), nan=0.0)
        qs = _sanitize(q_std_ref[...].astype(jnp.float32), nan=1e-10)

        p_mean = prior_ref[0:1, :]           # (1, lanes)
        half_inv_p_var = prior_ref[1:2, :]   # 0.5 / p_var
        p_const = prior_ref[2:3, :]          # 0.5 * (log(p_var) - 1)

        diff = qm - p_mean
        q_var = qs * qs
        # KL(N(qm,qs) || N(pm,ps)) elementwise, constants folded:
        #   (q_var + diff^2) * 0.5/p_var + 0.5*(log p_var - 1) - 0.5*log(q_var)
        kl = (q_var + diff * diff) * half_inv_p_var + p_const - 0.5 * jnp.log(q_var)

        if mask_rows:
            row = jax.lax.broadcasted_iota(jnp.int32, kl.shape, 0) + i * tile_rows
            kl = jnp.where(row < total_rows, kl, 0.0)

        # Vreg-wise sublane tree-add: (tile_rows, lanes) -> (8, lanes). Pure VALU adds,
        # no block-sized accumulator read/modify/write, no per-step cross-lane reduce.
        return jnp.sum(kl.reshape(tile_rows // 8, 8, lanes), axis=0)

    if total_rows % tile_rows != 0:
        # Only the last (ragged / padded) tile pays for the row mask; the unmasked
        # path is never taken on that tile.
        @pl.when(i < nt - 1)
        def _():
            out_ref[...] = partial_sum(False)

        @pl.when(i == nt - 1)
        def _():
            out_ref[...] = partial_sum(True)
    else:
        out_ref[...] = partial_sum(False)


def multivariate_normal_kl(post_mean, post_std, prior_mean, prior_logvar,
                           *, prior_packed=None, target_block_bytes=2 << 20):
    """Scalar mean-over-batch KL(posterior || prior), as in MultivariateNormal.forward.

    `prior_packed` (from pack_prior, shape (8, lanes)) may be passed in to hoist the
    prior preprocessing out of the per-call path."""
    D = post_mean.shape[-1]
    batch = math.prod(post_mean.shape[:-1]) or 1
    post_mean = post_mean.reshape(batch, D)
    post_std = post_std.reshape(batch, D)

    # ---- lane-dense layout: fold batch rows into the 128-lane axis when possible ----
    if D <= 128 and 128 % D == 0 and (batch * D) % 128 == 0:
        fold = 128 // D
        lanes = 128
        rows = (batch * D) // 128
        q_mean2d = post_mean.reshape(rows, lanes)   # contiguous row-major reshape: no copy
        q_std2d = post_std.reshape(rows, lanes)
    else:
        # TODO(synk): for D that does not fold into 128 lanes, pad the feature dim to a
        # multiple of 128 and carry a per-lane {0,1} mask row in prior_packed so vregs and
        # HBM bursts stay full-width.
        fold = 1
        lanes = D
        rows = batch
        q_mean2d = post_mean
        q_std2d = post_std

    if prior_packed is None:
        prior_packed = pack_prior(prior_mean, prior_logvar, fold=fold)
    assert prior_packed.shape == (8, lanes), (prior_packed.shape, lanes)

    # ---- tile sizing (f32-element accounting so in-kernel temporaries stay bounded) ----
    # ~2 MiB f32 per input block -> 2 inputs x 2 pipeline buffers = 8 MiB resident, plus
    # elementwise temporaries, comfortably inside the explicit 32 MiB scoped-VMEM limit
    # (v5e's *default* scoped VMEM is only 16 MiB; v6e default 32 MiB; v7x 64 MiB physical).
    max_tile_rows = max(8, (target_block_bytes // (lanes * 4)) // 8 * 8)
    rows_aligned = ((rows + 7) // 8) * 8
    if max_tile_rows >= rows_aligned:
        tile_rows = rows_aligned
        if rows_aligned != rows:
            # Tiny tail pad (<= 7 rows, only for small inputs); padded rows masked in-kernel.
            q_mean2d = jnp.pad(q_mean2d, ((0, rows_aligned - rows), (0, 0)))
            q_std2d = jnp.pad(q_std2d, ((0, rows_aligned - rows), (0, 0)))
        phys_rows = rows_aligned
    else:
        tile_rows = max_tile_rows
        phys_rows = rows
    num_tiles = int(pl.cdiv(phys_rows, tile_rows))

    kernel = functools.partial(_kl_partial_kernel, total_rows=rows,
                               tile_rows=tile_rows, lanes=lanes)

    # Per-tile (8, lanes) partial sums on a "parallel" grid axis: both TensorCores are
    # used on v7x; the tiny final reduction + 1/batch happens in the wrapper.
    partials = pl.pallas_call(
        kernel,
        out_shape=jax.ShapeDtypeStruct((num_tiles * 8, lanes), jnp.float32),
        grid_spec=pltpu.PrefetchScalarGridSpec(
            num_scalar_prefetch=0,
            grid=(num_tiles,),
            in_specs=[
                pl.BlockSpec((tile_rows, lanes), lambda i: (i, 0)),  # post_mean
                pl.BlockSpec((tile_rows, lanes), lambda i: (i, 0)),  # post_std
                pl.BlockSpec((8, lanes), lambda i: (0, 0)),          # prior constants
            ],
            out_specs=pl.BlockSpec((8, lanes), lambda i: (i, 0)),
        ),
        compiler_params=pltpu.CompilerParams(
            dimension_semantics=("parallel",),
            vmem_limit_bytes=32 * 1024 * 1024,
        ),
    )(q_mean2d, q_std2d, prior_packed)

    return jnp.sum(partials) * (1.0 / batch)


def reference_kl(post_mean, post_std, prior_mean, prior_logvar):
    """Plain-JAX reference with exact torch.nan_to_num(posinf=1e6, neginf=-1e6) semantics."""
    D = post_mean.shape[-1]
    q_mean = _nan_to_num_exact(post_mean.reshape(-1, D), nan=0.0)
    q_std = _nan_to_num_exact(post_std.reshape(-1, D), nan=1e-10)
    p_mean = _nan_to_num_exact(prior_mean, nan=0.0)
    p_std = _nan_to_num_exact(jnp.exp(0.5 * prior_logvar), nan=1e-10)
    var_ratio = (q_std / p_std) ** 2
    t1 = ((q_mean - p_mean) / p_std) ** 2
    kl_elem = 0.5 * (var_ratio + t1 - 1.0 - jnp.log(var_ratio))
    return jnp.mean(jnp.sum(kl_elem, axis=-1))


if __name__ == "__main__":
    # Module __init__ params (matches MultivariateNormal(mean, variance, shape)).
    prior_mean_val = 0.0
    prior_variance = 0.1
    D = 64            # "shape" argument of the module (feature dim)
    B = 16            # batch size

    prior_mean = jnp.ones((D,), jnp.float32) * prior_mean_val
    prior_logvar = jnp.log(jnp.ones((D,), jnp.float32) * prior_variance)

    key = jax.random.PRNGKey(0)
    k1, k2 = jax.random.split(key)
    post_mean = jax.random.normal(k1, (B, D), jnp.float32)
    post_std = jnp.abs(jax.random.normal(k2, (B, D), jnp.float32)) * 0.5 + 0.1

    # Main case: lane-dense folded path, single tile.
    kl = multivariate_normal_kl(post_mean, post_std, prior_mean, prior_logvar)
    kl = jax.block_until_ready(kl)
    ref = reference_kl(post_mean, post_std, prior_mean, prior_logvar)
    assert jnp.allclose(kl, ref, rtol=1e-4, atol=1e-4), (kl, ref)

    # Edge case: non-folded path, rows not a multiple of 8 (padded + masked single tile).
    B2 = 5
    pm2 = jax.random.normal(k1, (B2, D), jnp.float32)
    ps2 = jnp.abs(jax.random.normal(k2, (B2, D), jnp.float32)) * 0.5 + 0.1
    kl2 = jax.block_until_ready(multivariate_normal_kl(pm2, ps2, prior_mean, prior_logvar))
    ref2 = reference_kl(pm2, ps2, prior_mean, prior_logvar)
    assert jnp.allclose(kl2, ref2, rtol=1e-4, atol=1e-4), (kl2, ref2)

    # Edge case: multi-tile parallel grid with a ragged (masked) last tile.
    B3 = 40
    pm3 = jax.random.normal(k1, (B3, D), jnp.float32)
    ps3 = jnp.abs(jax.random.normal(k2, (B3, D), jnp.float32)) * 0.5 + 0.1
    kl3 = jax.block_until_ready(multivariate_normal_kl(
        pm3, ps3, prior_mean, prior_logvar, target_block_bytes=8 * 128 * 4))
    ref3 = reference_kl(pm3, ps3, prior_mean, prior_logvar)
    assert jnp.allclose(kl3, ref3, rtol=1e-4, atol=1e-4), (kl3, ref3)

    print("KERNEL_OK")
</pallas_src>

<mosaic_0001>
module attributes {stable_mosaic.version = 11 : i64} {
  func.func @_kl_partial_kernel(%arg0: i32, %arg1: memref<8x128xf32, #tpu.memory_space<vmem>>, %arg2: memref<8x128xf32, #tpu.memory_space<vmem>>, %arg3: memref<8x128xf32, #tpu.memory_space<vmem>>, %arg4: memref<8x128xf32, #tpu.memory_space<vmem>>) attributes {dimension_semantics = [#tpu.dimension_semantics<parallel>], iteration_bounds = array<i64: 1>, scalar_prefetch = 0 : i64, scratch_operands = 0 : i64, tpu.core_type = #tpu.core_type<tc>, window_params = [{transform_indices = @transform_0, window_bounds = array<i64: 8, 128>}, {transform_indices = @transform_1, window_bounds = array<i64: 8, 128>}, {pipeline_mode = #tpu.pipeline_mode<synchronous>, transform_indices = @transform_2, window_bounds = array<i64: 8, 128>}, {transform_indices = @transform_3, window_bounds = array<i64: 8, 128>}]} {
    %c0 = arith.constant 0 : index
    %c0_0 = arith.constant 0 : index
    %0 = vector.load %arg1[%c0, %c0_0] : memref<8x128xf32, #tpu.memory_space<vmem>>, vector<8x128xf32>
    %1 = arith.cmpf one, %0, %0 : vector<8x128xf32>
    %cst = arith.constant 0.000000e+00 : f32
    %2 = vector.broadcast %cst : f32 to vector<8x128xf32>
    %3 = arith.select %1, %2, %0 : vector<8x128xi1>, vector<8x128xf32>
    %cst_1 = arith.constant -1.000000e+06 : f32
    %cst_2 = arith.constant 1.000000e+06 : f32
    %4 = vector.broadcast %cst_1 : f32 to vector<8x128xf32>
    %5 = arith.maximumf %4, %3 : vector<8x128xf32>
    %6 = vector.broadcast %cst_2 : f32 to vector<8x128xf32>
    %7 = arith.minimumf %6, %5 : vector<8x128xf32>
    %c0_3 = arith.constant 0 : index
    %c0_4 = arith.constant 0 : index
    %8 = vector.load %arg2[%c0_3, %c0_4] : memref<8x128xf32, #tpu.memory_space<vmem>>, vector<8x128xf32>
    %9 = arith.cmpf one, %8, %8 : vector<8x128xf32>
    %cst_5 = arith.constant 1.000000e-10 : f32
    %10 = vector.broadcast %cst_5 : f32 to vector<8x128xf32>
    %11 = arith.select %9, %10, %8 : vector<8x128xi1>, vector<8x128xf32>
    %cst_6 = arith.constant -1.000000e+06 : f32
    %cst_7 = arith.constant 1.000000e+06 : f32
    %12 = vector.broadcast %cst_6 : f32 to vector<8x128xf32>
    %13 = arith.maximumf %12, %11 : vector<8x128xf32>
    %14 = vector.broadcast %cst_7 : f32 to vector<8x128xf32>
    %15 = arith.minimumf %14, %13 : vector<8x128xf32>
    %c0_8 = arith.constant 0 : index
    %c0_9 = arith.constant 0 : index
    %16 = vector.load %arg3[%c0_8, %c0_9] : memref<8x128xf32, #tpu.memory_space<vmem>>, vector<1x128xf32>
    %c1 = arith.constant 1 : index
    %c0_10 = arith.constant 0 : index
    %17 = vector.load %arg3[%c1, %c0_10] : memref<8x128xf32, #tpu.memory_space<vmem>>, vector<1x128xf32>
    %c2 = arith.constant 2 : index
    %c0_11 = arith.constant 0 : index
    %18 = vector.load %arg3[%c2, %c0_11] : memref<8x128xf32, #tpu.memory_space<vmem>>, vector<1x128xf32>
    %19 = vector.broadcast %16 : vector<1x128xf32> to vector<8x128xf32>
    %20 = arith.subf %7, %19 : vector<8x128xf32>
    %21 = arith.mulf %15, %15 : vector<8x128xf32>
    %22 = arith.mulf %20, %20 : vector<8x128xf32>
    %23 = arith.addf %21, %22 : vector<8x128xf32>
    %24 = vector.broadcast %17 : vector<1x128xf32> to vector<8x128xf32>
    %25 = arith.mulf %23, %24 : vector<8x128xf32>
    %26 = vector.broadcast %18 : vector<1x128xf32> to vector<8x128xf32>
    %27 = arith.addf %25, %26 : vector<8x128xf32>
    %28 = math.log %21 : vector<8x128xf32>
    %cst_12 = arith.constant 5.000000e-01 : f32
    %29 = vector.broadcast %cst_12 : f32 to vector<8x128xf32>
    %30 = arith.mulf %29, %28 : vector<8x128xf32>
    %31 = arith.subf %27, %30 : vector<8x128xf32>
    %32 = vector.shape_cast %31 : vector<8x128xf32> to vector<1x8x128xf32>
    %cst_13 = arith.constant dense<0.000000e+00> : vector<8x128xf32>
    %33 = vector.multi_reduction <add>, %32, %cst_13 [0] : vector<1x8x128xf32> to vector<8x128xf32>
    %c0_14 = arith.constant 0 : index
    %c0_15 = arith.constant 0 : index
    %34 = vector.load %arg4[%c0_14, %c0_15] : memref<8x128xf32, #tpu.memory_space<vmem>>, vector<8x128xf32>
    tpu.vector_store %arg4[%c0_14, %c0_15], %33 {strides = array<i32>} : memref<8x128xf32, #tpu.memory_space<vmem>>, vector<8x128xf32>,
    return
  }
  func.func @transform_0(%arg0: i32) -> (i32, i32) {
    %c0_i32 = arith.constant 0 : i32
    %c0_i32_0 = arith.constant 0 : i32
    return %arg0, %c0_i32 : i32, i32
  }
  func.func @transform_1(%arg0: i32) -> (i32, i32) {
    %c0_i32 = arith.constant 0 : i32
    %c0_i32_0 = arith.constant 0 : i32
    return %arg0, %c0_i32 : i32, i32
  }
  func.func @transform_2(%arg0: i32) -> (i32, i32) {
    %c0_i32 = arith.constant 0 : i32
    %c0_i32_0 = arith.constant 0 : i32
    %c0_i32_1 = arith.constant 0 : i32
    return %c0_i32, %c0_i32_0 : i32, i32
  }
  func.func @transform_3(%arg0: i32) -> (i32, i32) {
    %c0_i32 = arith.constant 0 : i32
    %c0_i32_0 = arith.constant 0 : i32
    return %arg0, %c0_i32 : i32, i32
  }
}

</mosaic_0001>

<bundles_post_ra>
// kernel: tpu_custom_call.1
= control target key start
LH: loop header
LB: loop body
LE: loop exit
PB: predicated region body
PF: predicated region fallthrough
CT: control target
= control target key end

     0   :  { %8 = vsyncpa [#allocation3], 0  ;;  %s251_s0 = inlined_call_operand.hbm [shape: f32[8,128], index: 0, kind: input, shape index: {}]   ;;  %s252_s1 = inlined_call_operand.hbm [shape: f32[8,128], index: 1, kind: input, shape index: {}]   ;;  %s253_s2 = inlined_call_operand.hbm [shape: f32[8,128], index: 2, kind: input, shape index: {}]   ;;  %s254_s3 = inlined_call_operand.hbm [shape: f32[8,128], index: 3, kind: output, shape index: {}]  }
   0x1   :  { %9 = vsyncpa [#allocation6], 0  ;;  %s27_s14 = sshll.u32 %s252_s1, 4  ;;  %s28_s14 = int_to_ptr.hbm [resolvable:$true] %s27_s14 }
   0x2   :  { %10 = vsyncpa [#allocation4], 0  ;;  %s215_s15 = smov [#allocation5]   ;;  %s16_s19 = sshll.u32 %s251_s0, 4  ;;  %s17_s19 = int_to_ptr.hbm [resolvable:$true] %s16_s19 }
   0x3   :  { %s29_s16 = sshll.u32 %s215_s15, 4  ;;  %s216_s20 = smov [#allocation2]   ;;  %s30_s16 = int_to_ptr.vmem [resolvable:$true] %s29_s16 }
   0x4   :  { %32 = dma.hbm_to_vmem [thread:$0]  %s28_s14, 128, %s30_s16, [#allocation6]  }
   0x5   :  { %s18_s21 = sshll.u32 %s216_s20, 4  ;;  %s38_s24 = sshll.u32 %s253_s2, 4  ;;  %s19_s21 = int_to_ptr.vmem [resolvable:$true] %s18_s21  ;;  %s39_s24 = int_to_ptr.hbm [resolvable:$true] %s38_s24 }
   0x6   :  { %21 = dma.hbm_to_vmem [thread:$0]  %s17_s19, 128, %s19_s21, [#allocation3]  }
   0x7   :  { %s217_s1 = smov [#allocation7]  }
   0x8   :  { %s40_s25 = sshll.u32 %s217_s1, 4  ;;  %s41_s25 = int_to_ptr.vmem [resolvable:$true] %s40_s25 }
   0x9   :  { %43 = dma.hbm_to_vmem [thread:$0]  %s39_s24, 128, %s41_s25, [#allocation6]  }
   0xa   :  { %209 = dma.done.wait [#allocation3], 128  }
   0xb   :  { %210 = vsyncadd [#allocation3], 4294967168 }
   0xc   :  { %211 = dma.done.wait [#allocation6], 256  }
   0xd   :  { %212 = vsyncadd [#allocation6], 4294967040  ;;  %v56_v0 = vld [vmem:[#allocation2] sm:$0xff]  ;;  %v61_v1 = vld [vmem:[#allocation5] sm:$0xff]  ;;  %s218_s0 = smov [#allocation8]   ;;  %s91_s28 = sshll.u32 %s254_s3, 4  ;;  %s92_s28 = int_to_ptr.hbm [resolvable:$true] %s91_s28 }
   0xe   :  { %vm57_vm0 = vcmp.ne.f32.partialorder %v56_v0, %v56_v0  ;;  %vm62_vm1 = vcmp.ne.f32.partialorder %v61_v1, %v61_v1  ;;  %v108_v2 = vld [vmem:[#allocation7] ss:$0 sm:$0xff]  ;;  %v109_v10 = vld [vmem:[#allocation7 + $0x1] ss:$0 sm:$0xff]  ;;  %v110_v12 = vld [vmem:[#allocation7 + $0x2] ss:$0 sm:$0xff] }
   0xf   :  { %v58_v3 = vsel %vm57_vm0, 0.0, %v56_v0  ;;  %v63_v4 = vsel %vm62_vm1, 1e-10, %v61_v1  ;;  %s89_s2 = sshll.u32 %s218_s0, 4  ;;  %s90_s2 = int_to_ptr.vmem [resolvable:$true] %s89_s2 }
  0x10   :  { %v102_v5 = vclamps-f32 %v58_v3, 1000000.0  ;;  %v103_v6 = vclamps-f32 %v63_v4, 1000000.0 }
  0x12   :  { %v70_v7 = vsub.f32 %v102_v5, %v108_v2  ;;  %v71_v8 = vmul.f32 %v103_v6, %v103_v6 }
  0x14   :  { %v72_v9 = vmul.f32 %v70_v7, %v70_v7  ;;  %111 = vlog2.f32 %v71_v8 }
  0x16   :  { %v73_v11 = vadd.f32 %v72_v9, %v71_v8 }
  0x18   :  { %v75_v13 = vmul.f32 %v109_v10, %v73_v11 }
  0x1a   :  { %v112_v14 = vpop.eup %111  ;;  %v77_v15 = vadd.f32 %v110_v12, %v75_v13 }
  0x1b   :  { %v79_v16 = vmul.f32 0.6931472, %v112_v14 }
  0x1d   :  { %v80_v17 = vmul.f32 0.5, %v79_v16 }
  0x1f   :  { %v81_v18 = vsub.f32 %v77_v15, %v80_v17 }
  0x21   :  { %83 = vst [vmem:[#allocation8] sm:$0xff] %v81_v18 }
  0x22   :  { %94 = dma.vmem_to_hbm [thread:$0]  %s90_s2, 128, %s92_s28, [#allocation4]  }
  0x23   :  { %213 = dma.done.wait [#allocation4], 128  }
  0x24   :  { %214 = vsyncadd [#allocation4], 4294967168 }
  0x25   :  { %99 = vsyncpa [#allocation3], 1 }
  0x26   :  { %100 = vsyncpa [#allocation6], 1 }
  0x27   :  { %101 = vsyncpa [#allocation4], 1 }

</bundles_post_ra>
